<compile_context>
chip_gen: v7x
topology: tpu7x:2x2x1
jax: 0.10.0
libtpu: 0.0.40
codegen_flags: <defaults>
</compile_context>

<pallas_src>
import jax
import jax.numpy as jnp
from jax.experimental import pallas as pl
from jax.experimental.pallas import tpu as pltpu

_INV_SQRT2 = 0.7071067811865476


def _mlp_kernel(x_ref, w1_ref, b1_ref, w2_ref, b2_ref, o_ref, acc_ref):
    """One (row-tile, d-slab) step of the fused fc1 -> GELU -> fc2."""
    d = pl.program_id(1)

    @pl.when(d == 0)
    def _init():
        acc_ref[...] = jnp.zeros_like(acc_ref)

    # fc1 slab (MXU, f32 accumulation) + bias, exact erf GELU in f32
    # (matches torch.nn.functional.gelu default).
    h = jnp.dot(x_ref[...], w1_ref[...], preferred_element_type=jnp.float32)
    h = h + b1_ref[...].astype(jnp.float32)
    h = 0.5 * h * (1.0 + jax.lax.erf(h * _INV_SQRT2))

    # TODO(synk): dropout is identity in inference mode; training-mode dropout
    # would use pltpu.prng_seed / pltpu.prng_random_bits here and after fc2.

    # fc2 partial product, accumulated in f32 VMEM.
    acc_ref[...] += jnp.dot(h.astype(w2_ref.dtype), w2_ref[...],
                            preferred_element_type=jnp.float32)

    @pl.when(d == pl.num_programs(1) - 1)
    def _finalize():
        o_ref[...] = (acc_ref[...] + b2_ref[...].astype(jnp.float32)
                      ).astype(o_ref.dtype)


def _cdiv(a, b):
    return -(-a // b)


def _round_up(a, b):
    return _cdiv(a, b) * b


def _vmem_capacity_bytes():
    try:
        info = pltpu.get_tpu_info()
        cap = getattr(info, "vmem_capacity_bytes", None)
        if cap:
            return int(cap)
    except Exception:
        pass
    return 64 * 1024 * 1024  # conservative fallback (v7x per-TC VMEM)


def mlp_forward(x, w1, b1, w2, b2, *, compute_dtype=None):
    """x: [B, S, H]; w1: [H, D]; b1: [D]; w2: [D, H]; b2: [H] -> [B, S, H].

    compute_dtype=jnp.bfloat16 feeds bf16 operands to the MXU (f32 accumulation
    and f32 GELU math are kept).  Output stays in x.dtype.
    """
    B, S, H = x.shape
    D = w1.shape[1]
    M = B * S
    out_dtype = x.dtype

    x2d = x.reshape(M, H)
    if compute_dtype is not None:
        x2d = x2d.astype(compute_dtype)
        w1 = w1.astype(compute_dtype)
        w2 = w2.astype(compute_dtype)
    b1_2d = b1.reshape(1, D)
    b2_2d = b2.reshape(1, H)

    xi = jnp.dtype(x2d.dtype).itemsize
    wi = jnp.dtype(w1.dtype).itemsize
    bi = jnp.dtype(b1_2d.dtype).itemsize
    oi = jnp.dtype(out_dtype).itemsize

    # ---- per-TensorCore VMEM budget ---------------------------------------
    vmem_cap = _vmem_capacity_bytes()
    budget = int(0.8 * vmem_cap)  # headroom for compiler-internal scratch

    def footprint(tm, td):
        # Assume the pipeline double-buffers every BlockSpec operand (even the
        # constant-index weight blocks), plus the f32 accumulator scratch.
        return (2 * tm * H * xi                 # x tile
                + 2 * (H * td + td * H) * wi    # w1 / w2 slabs
                + 2 * (td + H) * bi             # biases
                + 2 * tm * H * oi               # out tile
                + tm * H * 4)                   # f32 accumulator

    # ---- tile selection -----------------------------------------------------
    row_align = {4: 8, 2: 16, 1: 32}.get(xi, 8)   # sublane packing per dtype
    if M <= 512:
        tm_candidates = [min(_round_up(M, row_align), 512)]
    else:
        tm_candidates = [512, 256, 128]
    td_candidates = [D] + [c for c in (2048, 1024, 512, 256, 128)
                           if c < D and D % c == 0]

    TM, TD = tm_candidates[-1], td_candidates[-1]
    found = False
    for td in td_candidates:            # prefer fully-resident weights (td == D)
        for tm in tm_candidates:        # then the largest row tile that fits
            if footprint(tm, td) <= budget:
                TM, TD = tm, td
                found = True
                break
        if found:
            break

    grid_m = _cdiv(M, TM)
    # Prefer an even number of row tiles so v7x's two TensorCores stay balanced.
    if grid_m > 1 and grid_m % 2 == 1:
        for tm in tm_candidates:
            if tm < TM and _cdiv(M, tm) % 2 == 0 and footprint(tm, TD) <= budget:
                TM = tm
                grid_m = _cdiv(M, tm)
                break
    grid_d = _cdiv(D, TD)

    # Tiny-M corner only: if the row tile exceeds M, pad (cheap).  Otherwise
    # rely on Pallas partial last-row-block handling (no pad / slice copies).
    Mp = M
    if TM > M:
        Mp = TM
        x2d = jnp.pad(x2d, ((0, Mp - M), (0, 0)))

    vmem_limit = max(footprint(TM, TD) + (4 << 20), 32 << 20)
    vmem_limit = int(min(vmem_limit, int(0.9 * vmem_cap)))

    weight_passes = 1 if grid_d == 1 else grid_m  # streamed weights re-read per row tile
    cost = pl.CostEstimate(
        flops=2 * M * H * D * 2,                  # fc1 + fc2
        transcendentals=M * D,                    # one erf per intermediate element
        bytes_accessed=(M * H * xi + M * H * oi
                        + weight_passes * (H * D + D * H) * wi
                        + (D + H) * bi),
    )

    out = pl.pallas_call(
        _mlp_kernel,
        out_shape=jax.ShapeDtypeStruct((Mp, H), out_dtype),
        grid_spec=pltpu.PrefetchScalarGridSpec(
            num_scalar_prefetch=0,
            grid=(_cdiv(Mp, TM), grid_d),
            in_specs=[
                pl.BlockSpec((TM, H), lambda i, d: (i, 0)),   # x row tile
                pl.BlockSpec((H, TD), lambda i, d: (0, d)),   # w1 slab
                pl.BlockSpec((1, TD), lambda i, d: (0, d)),   # b1 slab
                pl.BlockSpec((TD, H), lambda i, d: (d, 0)),   # w2 slab
                pl.BlockSpec((1, H), lambda i, d: (0, 0)),    # b2
            ],
            out_specs=pl.BlockSpec((TM, H), lambda i, d: (i, 0)),
            scratch_shapes=[pltpu.VMEM((TM, H), jnp.float32)],  # fc2 accumulator
        ),
        compiler_params=pltpu.CompilerParams(
            dimension_semantics=("parallel", "arbitrary"),
            vmem_limit_bytes=vmem_limit,
        ),
        cost_estimate=cost,
    )(x2d, w1, b1_2d, w2, b2_2d)

    if Mp != M:
        out = out[:M]
    return out.reshape(B, S, H)


def xavier_uniform(key, shape, dtype=jnp.float32):
    # matches nn.init.xavier_uniform_ for a 2D weight: limit = sqrt(6/(fan_in+fan_out))
    fan_in, fan_out = shape[0], shape[1]
    limit = (6.0 / (fan_in + fan_out)) ** 0.5
    return jax.random.uniform(key, shape, dtype, minval=-limit, maxval=limit)


if __name__ == "__main__":
    # small config: hidden_size=32, mlp_dim=64, batch=2, seq=8
    B, S, H, D = 2, 8, 32, 64
    key = jax.random.PRNGKey(0)
    k_x, k_w1, k_b1, k_w2, k_b2 = jax.random.split(key, 5)

    x = jax.random.normal(k_x, (B, S, H), dtype=jnp.float32)
    # store weights as [in, out] so the kernel computes x @ w directly
    w1 = xavier_uniform(k_w1, (H, D))
    b1 = 1e-6 * jax.random.normal(k_b1, (D,), dtype=jnp.float32)
    w2 = xavier_uniform(k_w2, (D, H))
    b2 = 1e-6 * jax.random.normal(k_b2, (H,), dtype=jnp.float32)

    # pure-JAX reference (exact erf GELU, f32 everywhere)
    ref = jax.nn.gelu(x @ w1 + b1, approximate=False) @ w2 + b2

    # f32 path (matches torch default erf GELU tightly)
    y = mlp_forward(x, w1, b1, w2, b2)
    jax.block_until_ready(y)
    assert jnp.allclose(y, ref, atol=1e-5, rtol=1e-5), "f32 mismatch vs reference"

    # bf16 MXU path (f32 accumulation) — mixed-precision, loose tolerance
    y_bf16 = mlp_forward(x, w1, b1, w2, b2, compute_dtype=jnp.bfloat16)
    jax.block_until_ready(y_bf16)
    assert jnp.allclose(y_bf16, ref, atol=1e-1, rtol=1e-1), "bf16 mismatch vs reference"

    print("KERNEL_OK")
</pallas_src>

<mosaic_0001>
module attributes {stable_mosaic.version = 11 : i64} {
  func.func @_mlp_kernel(%arg0: i32, %arg1: i32, %arg2: memref<16x32xf32, #tpu.memory_space<vmem>>, %arg3: memref<32x64xf32, #tpu.memory_space<vmem>>, %arg4: memref<1x64xf32, #tpu.memory_space<vmem>>, %arg5: memref<64x32xf32, #tpu.memory_space<vmem>>, %arg6: memref<1x32xf32, #tpu.memory_space<vmem>>, %arg7: memref<16x32xf32, #tpu.memory_space<vmem>>, %arg8: memref<16x32xf32, #tpu.memory_space<vmem>>) attributes {dimension_semantics = [#tpu.dimension_semantics<parallel>, #tpu.dimension_semantics<arbitrary>], iteration_bounds = array<i64: 1, 1>, scalar_prefetch = 0 : i64, scratch_operands = 1 : i64, tpu.core_type = #tpu.core_type<tc>, window_params = [{transform_indices = @transform_0, window_bounds = array<i64: 16, 32>}, {transform_indices = @transform_1, window_bounds = array<i64: 32, 64>}, {transform_indices = @transform_2, window_bounds = array<i64: 1, 64>}, {transform_indices = @transform_3, window_bounds = array<i64: 64, 32>}, {pipeline_mode = #tpu.pipeline_mode<synchronous>, transform_indices = @transform_4, window_bounds = array<i64: 1, 32>}, {transform_indices = @transform_5, window_bounds = array<i64: 16, 32>}]} {
    %c0_i32 = arith.constant 0 : i32
    %0 = arith.cmpi eq, %arg1, %c0_i32 : i32
    %1 = arith.extui %0 : i1 to i32
    %c0_i32_0 = arith.constant 0 : i32
    %2 = arith.cmpi ne, %1, %c0_i32_0 : i32
    scf.if %2 {
      %cst_18 = arith.constant 0.000000e+00 : f32
      %25 = vector.broadcast %cst_18 : f32 to vector<16x32xf32>
      %c0_19 = arith.constant 0 : index
      %c0_20 = arith.constant 0 : index
      %26 = vector.load %arg8[%c0_19, %c0_20] : memref<16x32xf32, #tpu.memory_space<vmem>>, vector<16x32xf32>
      tpu.vector_store %arg8[%c0_19, %c0_20], %25 {strides = array<i32>} : memref<16x32xf32, #tpu.memory_space<vmem>>, vector<16x32xf32>,
    } else {
    }
    %c0 = arith.constant 0 : index
    %c0_1 = arith.constant 0 : index
    %3 = vector.load %arg2[%c0, %c0_1] : memref<16x32xf32, #tpu.memory_space<vmem>>, vector<16x32xf32>
    %c0_2 = arith.constant 0 : index
    %c0_3 = arith.constant 0 : index
    %4 = vector.load %arg3[%c0_2, %c0_3] : memref<32x64xf32, #tpu.memory_space<vmem>>, vector<32x64xf32>
    %cst = arith.constant dense<0.000000e+00> : vector<16x64xf32>
    %5 = tpu.matmul %3, %4, %cst {dimension_numbers = #tpu.dot_dimension_numbers<[1], [0], [0], [1], [0, 0, 1, 1], [], []>} : vector<16x32xf32>, vector<32x64xf32>, vector<16x64xf32> -> vector<16x64xf32>
    %c0_4 = arith.constant 0 : index
    %c0_5 = arith.constant 0 : index
    %6 = vector.load %arg4[%c0_4, %c0_5] : memref<1x64xf32, #tpu.memory_space<vmem>>, vector<1x64xf32>
    %7 = vector.broadcast %6 : vector<1x64xf32> to vector<16x64xf32>
    %8 = arith.addf %5, %7 : vector<16x64xf32>
    %cst_6 = arith.constant 5.000000e-01 : f32
    %9 = vector.broadcast %cst_6 : f32 to vector<16x64xf32>
    %10 = arith.mulf %9, %8 : vector<16x64xf32>
    %cst_7 = arith.constant 0.707106769 : f32
    %11 = vector.broadcast %cst_7 : f32 to vector<16x64xf32>
    %12 = arith.mulf %8, %11 : vector<16x64xf32>
    %13 = math.erf %12 : vector<16x64xf32>
    %cst_8 = arith.constant 1.000000e+00 : f32
    %14 = vector.broadcast %cst_8 : f32 to vector<16x64xf32>
    %15 = arith.addf %14, %13 : vector<16x64xf32>
    %16 = arith.mulf %10, %15 : vector<16x64xf32>
    %c0_9 = arith.constant 0 : index
    %c0_10 = arith.constant 0 : index
    %17 = vector.load %arg8[%c0_9, %c0_10] : memref<16x32xf32, #tpu.memory_space<vmem>>, vector<16x32xf32>
    %c0_11 = arith.constant 0 : index
    %c0_12 = arith.constant 0 : index
    %18 = vector.load %arg5[%c0_11, %c0_12] : memref<64x32xf32, #tpu.memory_space<vmem>>, vector<64x32xf32>
    %cst_13 = arith.constant dense<0.000000e+00> : vector<16x32xf32>
    %19 = tpu.matmul %16, %18, %cst_13 {dimension_numbers = #tpu.dot_dimension_numbers<[1], [0], [0], [1], [0, 0, 1, 1], [], []>} : vector<16x64xf32>, vector<64x32xf32>, vector<16x32xf32> -> vector<16x32xf32>
    %20 = arith.addf %17, %19 : vector<16x32xf32>
    %c0_14 = arith.constant 0 : index
    %c0_15 = arith.constant 0 : index
    %21 = vector.load %arg8[%c0_14, %c0_15] : memref<16x32xf32, #tpu.memory_space<vmem>>, vector<16x32xf32>
    tpu.vector_store %arg8[%c0_14, %c0_15], %20 {strides = array<i32>} : memref<16x32xf32, #tpu.memory_space<vmem>>, vector<16x32xf32>,
    %c0_i32_16 = arith.constant 0 : i32
    %22 = arith.cmpi eq, %arg1, %c0_i32_16 : i32
    %23 = arith.extui %22 : i1 to i32
    %c0_i32_17 = arith.constant 0 : i32
    %24 = arith.cmpi ne, %23, %c0_i32_17 : i32
    scf.if %24 {
      %c0_18 = arith.constant 0 : index
      %c0_19 = arith.constant 0 : index
      %25 = vector.load %arg8[%c0_18, %c0_19] : memref<16x32xf32, #tpu.memory_space<vmem>>, vector<16x32xf32>
      %c0_20 = arith.constant 0 : index
      %c0_21 = arith.constant 0 : index
      %26 = vector.load %arg6[%c0_20, %c0_21] : memref<1x32xf32, #tpu.memory_space<vmem>>, vector<1x32xf32>
      %27 = vector.broadcast %26 : vector<1x32xf32> to vector<16x32xf32>
      %28 = arith.addf %25, %27 : vector<16x32xf32>
      %c0_22 = arith.constant 0 : index
      %c0_23 = arith.constant 0 : index
      %29 = vector.load %arg7[%c0_22, %c0_23] : memref<16x32xf32, #tpu.memory_space<vmem>>, vector<16x32xf32>
      tpu.vector_store %arg7[%c0_22, %c0_23], %28 {strides = array<i32>} : memref<16x32xf32, #tpu.memory_space<vmem>>, vector<16x32xf32>,
    } else {
    }
    return
  }
  func.func @transform_0(%arg0: i32, %arg1: i32) -> (i32, i32) {
    %c0_i32 = arith.constant 0 : i32
    %c0_i32_0 = arith.constant 0 : i32
    return %arg0, %c0_i32 : i32, i32
  }
  func.func @transform_1(%arg0: i32, %arg1: i32) -> (i32, i32) {
    %c0_i32 = arith.constant 0 : i32
    %c0_i32_0 = arith.constant 0 : i32
    return %c0_i32, %arg1 : i32, i32
  }
  func.func @transform_2(%arg0: i32, %arg1: i32) -> (i32, i32) {
    %c0_i32 = arith.constant 0 : i32
    %c0_i32_0 = arith.constant 0 : i32
    return %c0_i32, %arg1 : i32, i32
  }
  func.func @transform_3(%arg0: i32, %arg1: i32) -> (i32, i32) {
    %c0_i32 = arith.constant 0 : i32
    %c0_i32_0 = arith.constant 0 : i32
    return %arg1, %c0_i32 : i32, i32
  }
  func.func @transform_4(%arg0: i32, %arg1: i32) -> (i32, i32) {
    %c0_i32 = arith.constant 0 : i32
    %c0_i32_0 = arith.constant 0 : i32
    %c0_i32_1 = arith.constant 0 : i32
    return %c0_i32, %c0_i32_0 : i32, i32
  }
  func.func @transform_5(%arg0: i32, %arg1: i32) -> (i32, i32) {
    %c0_i32 = arith.constant 0 : i32
    %c0_i32_0 = arith.constant 0 : i32
    return %arg0, %c0_i32 : i32, i32
  }
}

</mosaic_0001>

<bundles_post_ra>
// kernel: tpu_custom_call.1
= control target key start
LH: loop header
LB: loop body
LE: loop exit
PB: predicated region body
PF: predicated region fallthrough
CT: control target
= control target key end

     0   :  { %vm25_vm0 = vcmask 261120   ;;  %s471_s0 = inlined_call_operand.vmem [shape: f32[16,32], index: 0, kind: input, shape index: {}]   ;;  %s472_s1 = inlined_call_operand.vmem [shape: f32[32,64], index: 1, kind: input, shape index: {}]   ;;  %s473_s2 = inlined_call_operand.vmem [shape: f32[1,64], index: 2, kind: input, shape index: {}]   ;;  %s474_s3 = inlined_call_operand.vmem [shape: f32[64,32], index: 3, kind: input, shape index: {}]   ;;  %s475_s4 = inlined_call_operand.vmem [shape: f32[1,32], index: 4, kind: input, shape index: {}]   ;;  %s476_s5 = inlined_call_operand.hbm [shape: f32[16,32], index: 5, kind: output, shape index: {}]  }
   0x1   :  { %v30_v0 = vld [vmem:[%s472_s1] sm:$0xff]  ;;  %v31_v1 = vld [vmem:[%s472_s1 + $0x8] sm:$0xff]  ;;  %v32_v2 = vld [vmem:[%s472_s1 + $0x10] sm:$0xff] }
   0x2   :  { %v313_v3 = vpack.c.bf16 %v31_v1, %v30_v0  ;;  %v33_v4 = vld [vmem:[%s472_s1 + $0x18] sm:$0xff]  ;;  %v28_v5 = vld [vmem:[%s471_s0] sm:$0xff] }
   0x3   :  { %v317_v6 = vpack.c.bf16 %v33_v4, %v32_v2  ;;  %291 = vmatprep.mubr.msk.f32.mxu0 %vm25_vm0, %v28_v5 }
   0x4   :  { %10 = vsyncpa [#allocation4], 0  ;;  %314 = vmatprep.subr.bf16.mxu0 %v313_v3  ;;  %v29_v7 = vld [vmem:[%s471_s0 + $0x8] sm:$0xff]  ;;  %v135_v8 = vld [vmem:[%s474_s3] sm:$0xff]  ;;  %v369_v20 = vmov 0.0   ;;  %vm143_vm1 = vcmask 523264  }
   0x5   :  { %316 = vmatpush3.bf16.msra.mxu0 %v313_v3  ;;  %v136_v9 = vld [vmem:[%s474_s3 + $0x8] sm:$0xff]  ;;  %v137_v11 = vld [vmem:[%s474_s3 + $0x10] sm:$0xff]  ;;  %v138_v12 = vld [vmem:[%s474_s3 + $0x18] sm:$0xff]  ;;  %27 = vst.msk [vmem:[#allocation2 + $0x8] sm:$0xff] %vm25_vm0, %v369_v20  ;;  %s370_s21 = smov [#allocation3]  }
   0x6   :  { %318 = vmatprep.subr.bf16.mxu0 %v317_v6  ;;  %v321_v10 = vpack.c.bf16 %v136_v9, %v135_v8  ;;  %v325_v13 = vpack.c.bf16 %v138_v12, %v137_v11  ;;  %v139_v14 = vld [vmem:[%s474_s3 + $0x20] sm:$0xff]  ;;  %v140_v15 = vld [vmem:[%s474_s3 + $0x28] sm:$0xff]  ;;  %v141_v17 = vld [vmem:[%s474_s3 + $0x30] sm:$0xff]  ;;  %26 = vst.msk [vmem:[#allocation2] sm:$0xff] %vm25_vm0, %v369_v20  ;;  %s250_s22 = sshll.u32 %s370_s21, 4  ;;  %s251_s22 = int_to_ptr.vmem [resolvable:$true] %s250_s22 }
   0x7   :  { %v329_v16 = vpack.c.bf16 %v140_v15, %v139_v14  ;;  %v142_v18 = vld [vmem:[%s474_s3 + $0x38] sm:$0xff]  ;;  %v261_v21 = vld [vmem:[%s473_s2] ss:$0 sm:$0xff]  ;;  %s345_s23 = scalar_lea.vmem %s251_s22, 256  ;;  %p350_p1 = scmp.lt.s32.totalorder %s251_s22, %s251_s22 }
   0x8   :  { %322 = vmatprep.subr.bf16.mxu1 %v321_v10  ;;  %v333_v19 = vpack.c.bf16 %v142_v18, %v141_v17  ;;  %v266_v42 = vld [vmem:[%s475_s4] ss:$0 sm:$0xff]  ;;  %p346_p0 = scmp.ne.s32.totalorder %s251_s22, %s345_s23  ;;  %p351_p2 = scmp.lt.s32.totalorder %s345_s23, %s345_s23 }
   0x9   :  { %320 = vmatpush3.bf16.msra.mxu0 %v317_v6  ;;  %324 = vmatpush3.bf16.msra.mxu1 %v321_v10 }
   0xa   :  { %326 = vmatprep.subr.bf16.mxu1 %v325_v13  ;;  %p352_p3 = por %p351_p2, %p350_p1 }
   0xc   :  { %292 = vmatmul.mubr.msk.f32.vlgmr.msra.gmra.mrb[0].mxu0 %vm25_vm0, %v29_v7  ;;  %v134_v36 = vld [vmem:[#allocation2 + $0x8] sm:$0xff]  ;;  %p353_p4 = pnand %p352_p3, %p346_p0 }
   0xd   :  { %328 = vmatpush3.bf16.msra.mxu1 %v325_v13  ;;  %v133_v37 = vld [vmem:[#allocation2] sm:$0xff] }
   0xe   :  { %330 = vmatprep.subr.bf16.mxu1 %v329_v16 }
  0x11   :  { %332 = vmatpush3.bf16.msra.mxu1 %v329_v16 }
  0x12   :  { %334 = vmatprep.subr.bf16.mxu1 %v333_v19 }
  0x15   :  { %336 = vmatpush3.bf16.msra.mxu1 %v333_v19 }
  0xdf   :  { %v293_v22 = vpop.f32.mrb[0].mxu0 }
  0xe0   :  { %v120_v23 = vadd.f32 %v293_v22, %v261_v21  ;;  %v114_v24 = vpop.f32.mrb[1].mxu0 }
  0xe1   :  { %v115_v25 = vadd.f32 %v261_v21, %v114_v24 }
  0xe2   :  { %v126_v26 = vmul.f32 0.70710677, %v120_v23  ;;  %v124_v33 = vmul.f32 0.5, %v120_v23 }
  0xe3   :  { %v125_v27 = vmul.f32 0.70710677, %v115_v25  ;;  %v123_v31 = vmul.f32 0.5, %v115_v25 }
  0xe4   :  { %341 = verf.f32 %v126_v26 }
  0xe5   :  { %343 = verf.f32 %v125_v27 }
  0xee   :  { %v342_v28 = vpop.eup %341 }
  0xef   :  { %v344_v29 = vpop.eup %343  ;;  %v130_v30 = vadd.f32 1.0, %v342_v28 }
  0xf0   :  { %v129_v32 = vadd.f32 1.0, %v344_v29 }
  0xf1   :  { %v132_v35 = vmul.f32 %v130_v30, %v124_v33 }
  0xf2   :  { %v131_v34 = vmul.f32 %v129_v32, %v123_v31 }
  0xf4   :  { %310 = vmatprep.mubr.msk.f32.mxu1 %vm143_vm1, %v131_v34 }
  0xf5   :  { %311 = vmatmul.mubr.msk.f32.vlgmr.msra.gmra.mrb[0].mxu1 %vm143_vm1, %v132_v35 }
 0x1c8   :  { %v312_v38 = vpop.f32.mrb[0].mxu1 }
 0x1c9   :  { %v226_v39 = vadd.f32 %v312_v38, %v134_v36  ;;  %v216_v40 = vpop.f32.mrb[1].mxu1 }
 0x1ca   :  { %v225_v41 = vadd.f32 %v216_v40, %v133_v37 }
 0x1cb   :  { %228 = vst.msk [vmem:[#allocation2 + $0x8] sm:$0xff] %vm25_vm0, %v226_v39 }
 0x1cc   :  { %227 = vst.msk [vmem:[#allocation2] sm:$0xff] %vm25_vm0, %v225_v41 }
 0x1d2   :  { %v233_v43 = vld [vmem:[#allocation2 + $0x8] sm:$0xff] }
 0x1d3   :  { %v232_v44 = vld [vmem:[#allocation2] sm:$0xff]  ;;  %v242_v45 = vadd.f32 %v266_v42, %v233_v43 }
 0x1d4   :  { %v241_v46 = vadd.f32 %v266_v42, %v232_v44 }
 0x1d5   :  { %244 = vst.msk [vmem:[#allocation3 + $0x8] sm:$0xff] %vm25_vm0, %v242_v45 }
 0x1d6   :  { %243 = vst.msk [vmem:[#allocation3] sm:$0xff] %vm25_vm0, %v241_v46 }
 0x1d7   :  { %356 = shalt.err (!%p353_p4)
}
 0x1d8   :  { %s357_s25 = scalar_lea.hbm %s476_s5, 256 }
 0x1d9   :  { %p358_p5 = scmp.ne.s32.totalorder %s476_s5, %s357_s25  ;;  %p361_p6 = scmp.lt.u32.totalorder %s357_s25, %s476_s5 }
 0x1db   :  { %p363_p7 = pnand %p361_p6, %p358_p5 }
 0x1dd   :  { %366 = shalt.err (!%p363_p7)
}
 0x1de   :  { %s371_s30 = smov 128   ;;  %s372_s1 = smov 8  }
 0x1df   :  { %256 = dma.vmem_to_hbm [thread:$0]  %s251_s22, 256, %s476_s5, [#allocation4], %s371_s30, %s371_s30, %s372_s1  }
 0x1e0   :  { %367 = dma.done.wait [#allocation4], 256  }
 0x1e1   :  { %368 = vsyncadd [#allocation4], 4294967040 }
 0x1e2   :  { %260 = vsyncpa [#allocation4], 1 }

</bundles_post_ra>
